<compile_context>
chip_gen: v7x
topology: tpu7x:2x2x1
jax: 0.10.0
libtpu: 0.0.40
codegen_flags: <defaults>
</compile_context>

<pallas_src>
import functools

import jax
import jax.numpy as jnp
from jax.experimental import pallas as pl
from jax.experimental.pallas import tpu as pltpu


_VMEM_LIMIT_BYTES = 32 * 1024 * 1024     # safe on v5e / v6e / v7x
_FUSED_SAMPLE_BUDGET = 2 * 1024 * 1024   # whole-sample path if one sample fits this
_TILE_BUDGET = 1 * 1024 * 1024           # per-tile budget for the two-pass path


# ----------------------------------------------------------------------------
# Kernels
# ----------------------------------------------------------------------------

def _ln_fused_kernel(x_ref, g_ref, b_ref, o_ref, *, eps, n_elems):
    """Single-pass LayerNorm: one whole (C, L) sample per grid step.

    x_ref: (1, C, L)   g_ref/b_ref: (C, 1)   o_ref: (1, C, L)
    """
    x = x_ref[0].astype(jnp.float32)                       # (C, L)
    mean = jnp.sum(x) / n_elems                            # mostly VPU adds + one reduce
    d = x - mean
    var = jnp.sum(d * d) / (n_elems - 1.0)                 # torch.std: unbiased
    inv = 1.0 / (jnp.sqrt(var) + eps)                      # single exact scalar divide
    scale = g_ref[...] * inv                               # (C, 1): fold 1/(std+eps) into gamma
    o_ref[0] = (d * scale + b_ref[...]).astype(o_ref.dtype)   # one FMA/elem, single store


def _ln_stats_kernel(x_ref, g_ref, b_ref, scale_ref, shift_ref, *, eps, n_elems):
    """Pass 1 (tiled path): accumulate per-channel partial sums / sum-of-squares
    across lane tiles; on the last tile finalize to per-sample fused affine
    vectors  scale = gamma/(std+eps),  shift = beta - mean*scale.

    x_ref: (1, C, T)   g_ref/b_ref: (C, 1)   scale_ref/shift_ref: (1, C, 1) f32
    """
    t = pl.program_id(1)
    x = x_ref[0].astype(jnp.float32)                       # (C, T)
    ps = jnp.sum(x, axis=1, keepdims=True)                 # (C, 1) partial sum
    pq = jnp.sum(x * x, axis=1, keepdims=True)             # (C, 1) partial sum-sq

    @pl.when(t == 0)
    def _():
        scale_ref[...] = jnp.zeros_like(scale_ref)
        shift_ref[...] = jnp.zeros_like(shift_ref)

    scale_ref[0] = scale_ref[0] + ps                       # resident accumulators
    shift_ref[0] = shift_ref[0] + pq

    @pl.when(t == pl.num_programs(1) - 1)
    def _():
        s = jnp.sum(scale_ref[...])                        # per-sample scalar sum
        q = jnp.sum(shift_ref[...])                        # per-sample scalar sum-sq
        mean = s / n_elems
        var = jnp.maximum((q - n_elems * mean * mean) / (n_elems - 1.0), 0.0)
        inv = 1.0 / (jnp.sqrt(var) + eps)
        sc = g_ref[...] * inv                              # (C, 1)
        scale_ref[0] = sc
        shift_ref[0] = b_ref[...] - mean * sc


def _ln_apply_kernel(x_ref, scale_ref, shift_ref, o_ref):
    """Pass 2 (tiled path): pure fused affine, one FMA per element.

    x_ref: (1, C, T)   scale_ref/shift_ref: (1, C, 1)   o_ref: (1, C, T)
    """
    x = x_ref[0].astype(jnp.float32)                       # (C, T)
    o_ref[0] = (x * scale_ref[0] + shift_ref[0]).astype(o_ref.dtype)


# ----------------------------------------------------------------------------
# Wrapper
# ----------------------------------------------------------------------------

def _pick_tile_l(total_l, cap):
    """Largest 128-multiple divisor of total_l that is <= cap; else total_l
    (a block equal to the full dim is always layout-legal)."""
    cap = max(1, min(int(total_l), int(cap)))
    best = total_l
    d = 128
    while d <= cap:
        if total_l % d == 0:
            best = d
        d += 128
    return best if best <= cap or best == total_l else total_l


def layer_norm(x, gamma, beta, *, eps=1e-5, block_l=None):
    """LayerNorm with the MUNIT custom-module semantics.

    x: (N, C, *spatial) (e.g. NCHW); gamma/beta: (C,) per-channel affine.
    block_l=None -> automatic: fused single-pass if a sample fits the VMEM
    budget, otherwise a two-pass kernel tiled along the flattened spatial axis.
    An explicit block_l forces the tiled two-pass path.
    """
    N, C = x.shape[0], x.shape[1]
    L = 1
    for s in x.shape[2:]:
        L *= s
    n_elems = C * L
    assert n_elems > 1, "LayerNorm over a single element divides by zero (n-1)."

    xr = x.reshape(N, C, L)                                 # free, contiguous
    g2 = gamma.reshape(C, 1).astype(jnp.float32)
    b2 = beta.reshape(C, 1).astype(jnp.float32)

    sample_bytes = n_elems * 4
    if block_l is None and sample_bytes <= _FUSED_SAMPLE_BUDGET:
        # --- fused single-pass path (best HBM traffic: 1 read + 1 write) -----
        out = pl.pallas_call(
            functools.partial(_ln_fused_kernel, eps=eps, n_elems=float(n_elems)),
            out_shape=jax.ShapeDtypeStruct((N, C, L), x.dtype),
            grid=(N,),
            in_specs=[
                pl.BlockSpec((1, C, L), lambda n: (n, 0, 0)),
                pl.BlockSpec((C, 1), lambda n: (0, 0)),
                pl.BlockSpec((C, 1), lambda n: (0, 0)),
            ],
            out_specs=pl.BlockSpec((1, C, L), lambda n: (n, 0, 0)),
            compiler_params=pltpu.CompilerParams(
                dimension_semantics=("parallel",),
                vmem_limit_bytes=_VMEM_LIMIT_BYTES),
        )(xr, g2, b2)
        return out.reshape(x.shape)

    # --- tiled two-pass path (bounded VMEM, many parallel grid points) -------
    if block_l is None:
        block_l = _pick_tile_l(L, _TILE_BUDGET // max(1, C * 4))
    else:
        block_l = _pick_tile_l(L, block_l)
    n_tiles = L // block_l

    scale, shift = pl.pallas_call(
        functools.partial(_ln_stats_kernel, eps=eps, n_elems=float(n_elems)),
        out_shape=(jax.ShapeDtypeStruct((N, C, 1), jnp.float32),
                   jax.ShapeDtypeStruct((N, C, 1), jnp.float32)),
        grid=(N, n_tiles),
        in_specs=[
            pl.BlockSpec((1, C, block_l), lambda n, t: (n, 0, t)),
            pl.BlockSpec((C, 1), lambda n, t: (0, 0)),
            pl.BlockSpec((C, 1), lambda n, t: (0, 0)),
        ],
        out_specs=(pl.BlockSpec((1, C, 1), lambda n, t: (n, 0, 0)),
                   pl.BlockSpec((1, C, 1), lambda n, t: (n, 0, 0))),
        compiler_params=pltpu.CompilerParams(
            dimension_semantics=("parallel", "arbitrary"),   # reduction axis last
            vmem_limit_bytes=_VMEM_LIMIT_BYTES),
    )(xr, g2, b2)

    out = pl.pallas_call(
        _ln_apply_kernel,
        out_shape=jax.ShapeDtypeStruct((N, C, L), x.dtype),
        grid=(N, n_tiles),
        in_specs=[
            pl.BlockSpec((1, C, block_l), lambda n, t: (n, 0, t)),
            pl.BlockSpec((1, C, 1), lambda n, t: (n, 0, 0)),
            pl.BlockSpec((1, C, 1), lambda n, t: (n, 0, 0)),
        ],
        out_specs=pl.BlockSpec((1, C, block_l), lambda n, t: (n, 0, t)),
        compiler_params=pltpu.CompilerParams(
            dimension_semantics=("parallel", "parallel"),
            vmem_limit_bytes=_VMEM_LIMIT_BYTES),
    )(xr, scale, shift)
    return out.reshape(x.shape)


# ----------------------------------------------------------------------------
# Pure-JAX reference (exact PyTorch-module formula) and demo
# ----------------------------------------------------------------------------

def layer_norm_ref(x, gamma, beta, eps=1e-5):
    n = x.shape[0]
    flat = x.reshape(n, -1).astype(jnp.float32)
    bshape = (n,) + (1,) * (x.ndim - 1)
    mean = jnp.mean(flat, axis=1).reshape(bshape)
    std = jnp.std(flat, axis=1, ddof=1).reshape(bshape)    # torch.std: unbiased
    y = (x.astype(jnp.float32) - mean) / (std + eps)
    cshape = (1, -1) + (1,) * (x.ndim - 2)                  # per-channel (dim 1)
    return y * gamma.reshape(cshape) + beta.reshape(cshape)


if __name__ == "__main__":
    key = jax.random.PRNGKey(0)
    kx, kg, kx1, kg1 = jax.random.split(key, 4)

    # Config A: NCHW (2, 4, 16, 16) — matches the PyTorch module layout.
    N, C, H, W = 2, 4, 16, 16
    x = jax.random.normal(kx, (N, C, H, W), jnp.float32)
    gamma = jax.random.uniform(kg, (C,), jnp.float32)       # module init: uniform_()
    beta = jnp.zeros((C,), jnp.float32)                     # module init: zeros
    ref = layer_norm_ref(x, gamma, beta)

    # Fused single-pass path.
    y_fused = jax.block_until_ready(layer_norm(x, gamma, beta))
    assert y_fused.shape == x.shape, y_fused.shape
    assert bool(jnp.all(jnp.isfinite(y_fused)))
    assert bool(jnp.allclose(y_fused, ref, rtol=1e-4, atol=1e-4))

    # Tiled two-pass path (what large images / tight VMEM budgets take).
    y_tiled = jax.block_until_ready(layer_norm(x, gamma, beta, block_l=128))
    assert bool(jnp.allclose(y_tiled, ref, rtol=1e-4, atol=1e-4))

    # Config B: batch-1 branch of the module (same math) with different dims.
    x1 = jax.random.normal(kx1, (1, 8, 8, 8), jnp.float32)
    g1 = jax.random.uniform(kg1, (8,), jnp.float32)
    b1 = jnp.zeros((8,), jnp.float32)
    y1 = jax.block_until_ready(layer_norm(x1, g1, b1))
    assert bool(jnp.allclose(y1, layer_norm_ref(x1, g1, b1), rtol=1e-4, atol=1e-4))

    print("KERNEL_OK")
</pallas_src>

<mosaic_0001>
module attributes {stable_mosaic.version = 11 : i64} {
  func.func @_ln_fused_kernel(%arg0: i32, %arg1: memref<1x4x256xf32, #tpu.memory_space<vmem>>, %arg2: memref<4x1xf32, #tpu.memory_space<vmem>>, %arg3: memref<4x1xf32, #tpu.memory_space<vmem>>, %arg4: memref<1x4x256xf32, #tpu.memory_space<vmem>>) attributes {dimension_semantics = [#tpu.dimension_semantics<parallel>], iteration_bounds = array<i64: 2>, scalar_prefetch = 0 : i64, scratch_operands = 0 : i64, tpu.core_type = #tpu.core_type<tc>, window_params = [{transform_indices = @transform_0, window_bounds = array<i64: 1, 4, 256>}, {pipeline_mode = #tpu.pipeline_mode<synchronous>, transform_indices = @transform_1, window_bounds = array<i64: 4, 1>}, {pipeline_mode = #tpu.pipeline_mode<synchronous>, transform_indices = @transform_2, window_bounds = array<i64: 4, 1>}, {transform_indices = @transform_3, window_bounds = array<i64: 1, 4, 256>}]} {
    %c0 = arith.constant 0 : index
    %c0_0 = arith.constant 0 : index
    %c0_1 = arith.constant 0 : index
    %0 = vector.load %arg1[%c0, %c0_0, %c0_1] : memref<1x4x256xf32, #tpu.memory_space<vmem>>, vector<1x4x256xf32>
    %1 = vector.shape_cast %0 : vector<1x4x256xf32> to vector<4x256xf32>
    %2 = vector.shape_cast %1 : vector<4x256xf32> to vector<1x4x256xf32>
    %cst = arith.constant dense<0.000000e+00> : vector<1xf32>
    %3 = vector.multi_reduction <add>, %2, %cst [1, 2] : vector<1x4x256xf32> to vector<1xf32>
    %4 = vector.shape_cast %3 : vector<1xf32> to vector<1x1x1xf32>
    %5 = vector.extract %4[0, 0, 0] : f32 from vector<1x1x1xf32>
    %cst_2 = arith.constant 1.024000e+03 : f32
    %6 = arith.divf %5, %cst_2 : f32
    %7 = vector.broadcast %6 : f32 to vector<4x256xf32>
    %8 = arith.subf %1, %7 : vector<4x256xf32>
    %9 = arith.mulf %8, %8 : vector<4x256xf32>
    %10 = vector.shape_cast %9 : vector<4x256xf32> to vector<1x4x256xf32>
    %cst_3 = arith.constant dense<0.000000e+00> : vector<1xf32>
    %11 = vector.multi_reduction <add>, %10, %cst_3 [1, 2] : vector<1x4x256xf32> to vector<1xf32>
    %12 = vector.shape_cast %11 : vector<1xf32> to vector<1x1x1xf32>
    %13 = vector.extract %12[0, 0, 0] : f32 from vector<1x1x1xf32>
    %cst_4 = arith.constant 1.023000e+03 : f32
    %14 = arith.divf %13, %cst_4 : f32
    %15 = math.sqrt %14 : f32
    %cst_5 = arith.constant 9.99999974E-6 : f32
    %16 = arith.addf %15, %cst_5 : f32
    %cst_6 = arith.constant 1.000000e+00 : f32
    %17 = arith.divf %cst_6, %16 : f32
    %c0_7 = arith.constant 0 : index
    %c0_8 = arith.constant 0 : index
    %18 = vector.load %arg2[%c0_7, %c0_8] : memref<4x1xf32, #tpu.memory_space<vmem>>, vector<4x1xf32>
    %19 = vector.broadcast %17 : f32 to vector<4x1xf32>
    %20 = arith.mulf %18, %19 : vector<4x1xf32>
    %21 = vector.broadcast %20 : vector<4x1xf32> to vector<4x256xf32>
    %22 = arith.mulf %8, %21 : vector<4x256xf32>
    %c0_9 = arith.constant 0 : index
    %c0_10 = arith.constant 0 : index
    %23 = vector.load %arg3[%c0_9, %c0_10] : memref<4x1xf32, #tpu.memory_space<vmem>>, vector<4x1xf32>
    %24 = vector.broadcast %23 : vector<4x1xf32> to vector<4x256xf32>
    %25 = arith.addf %22, %24 : vector<4x256xf32>
    %c0_11 = arith.constant 0 : index
    %c0_12 = arith.constant 0 : index
    %c0_13 = arith.constant 0 : index
    %26 = vector.load %arg4[%c0_11, %c0_12, %c0_13] : memref<1x4x256xf32, #tpu.memory_space<vmem>>, vector<1x4x256xf32>
    %27 = vector.shape_cast %26 : vector<1x4x256xf32> to vector<4x256xf32>
    %28 = vector.shape_cast %25 : vector<4x256xf32> to vector<1x4x256xf32>
    tpu.vector_store %arg4[%c0_11, %c0_12, %c0_13], %28 {strides = array<i32>} : memref<1x4x256xf32, #tpu.memory_space<vmem>>, vector<1x4x256xf32>,
    return
  }
  func.func @transform_0(%arg0: i32) -> (i32, i32, i32) {
    %c0_i32 = arith.constant 0 : i32
    %c0_i32_0 = arith.constant 0 : i32
    %c0_i32_1 = arith.constant 0 : i32
    return %arg0, %c0_i32, %c0_i32_0 : i32, i32, i32
  }
  func.func @transform_1(%arg0: i32) -> (i32, i32) {
    %c0_i32 = arith.constant 0 : i32
    %c0_i32_0 = arith.constant 0 : i32
    %c0_i32_1 = arith.constant 0 : i32
    return %c0_i32, %c0_i32_0 : i32, i32
  }
  func.func @transform_2(%arg0: i32) -> (i32, i32) {
    %c0_i32 = arith.constant 0 : i32
    %c0_i32_0 = arith.constant 0 : i32
    %c0_i32_1 = arith.constant 0 : i32
    return %c0_i32, %c0_i32_0 : i32, i32
  }
  func.func @transform_3(%arg0: i32) -> (i32, i32, i32) {
    %c0_i32 = arith.constant 0 : i32
    %c0_i32_0 = arith.constant 0 : i32
    %c0_i32_1 = arith.constant 0 : i32
    return %arg0, %c0_i32, %c0_i32_0 : i32, i32, i32
  }
}

</mosaic_0001>

<bundles_post_ra>
// kernel: tpu_custom_call.1
= control target key start
LH: loop header
LB: loop body
LE: loop exit
PB: predicated region body
PF: predicated region fallthrough
CT: control target
= control target key end

     0   :  { %8 = vsyncpa [#allocation3], 0  ;;  %s733_s0 = inlined_call_operand.hbm [shape: f32[2,4,256], index: 0, kind: input, shape index: {}]   ;;  %s734_s1 = inlined_call_operand.vmem [shape: f32[4,1], index: 1, kind: input, shape index: {}]   ;;  %s735_s2 = inlined_call_operand.vmem [shape: f32[4,1], index: 2, kind: input, shape index: {}]   ;;  %s736_s3 = inlined_call_operand.hbm [shape: f32[2,4,256], index: 3, kind: output, shape index: {}]  }
   0x1   :  { %10 = vsyncpa [#allocation3 + $0x1], 0 }
   0x2   :  { %11 = vsyncpa [#allocation4], 0 }
   0x3   :  { %13 = vsyncpa [#allocation4 + $0x1], 0  ;;  %s558_s12 = smov 0   ;;  %s560_s13 = smov 0  }
   0x4   :  { %s562_s14 = smov 0   ;;  %s564_s15 = smov 0  }
   0x5 LB: > { %s579_s16 = sadd.s32 4294967295, %s532_s15   ;;  %s357_s17 = sadd.s32 4294967294, %s532_s15   ;;  %s532_s15 = sphi %s564_s15, %s751_s15   ;;  %s528_s14 = sphi %s562_s14, %s750_s14   ;;  %s524_s13 = sphi %s560_s13, %s749_s13   ;;  %s520_s12 = sphi %s558_s12, %s748_s12  }
   0x6   : > { %s583_s18 = sadd.s32 1, %s532_s15   ;;  %s26_s19 = sadd.s32 1, %s528_s14 }
   0x7   : > { %s23_s20 = ssub.s32 %s532_s15, %s583_s18  ;;  %p33_p0 = scmp.ne.s32.totalorder %s528_s14, %s524_s13 }
   0x8   : > { %p24_p1 = scmp.eq.s32.totalorder %s23_s20, 0  ;;  %p34_p2 = scmp.eq.s32.totalorder %s532_s15, 0 }
   0x9   : > { %p39_p3 = scmp.ne.s32.totalorder %s524_s13, %s520_s12  ;;  %p40_p4 = scmp.eq.s32.totalorder %s579_s16, 0 }
   0xa   : > { %s595_s21 = scalar_select %p24_p1, %s528_s14, %s26_s19  }
   0xb   : > { %p597_p5 = por %p34_p2, %p33_p0  ;;  %p601_p6 = por %p40_p4, %p39_p3 }
   0xc   : > { %p105_p7 = scmp.eq.s32.totalorder %s579_s16, 1  ;;  %p111_p8 = scmp.eq.s32.totalorder %s357_s17, 1 }
   0xd   : > { %p393_p10 = scmp.lt.s32.totalorder %s532_s15, 2  ;;  %s137_s26 = sand.u32 1, %s528_s14  }
   0xe   : > { %p608_p11 = por %p105_p7, %p33_p0  ;;  %p612_p12 = por %p111_p8, %p39_p3 }
   0xf   : > { %s371_s27 = sshll.u32 %s532_s15, 7  ;;  %s360_s28 = sshll.u32 %s137_s26, 3 }
  0x10   : > { %s740_s24 = scalar_select %p608_p11, 1, 0 }
  0x11   : > { %s741_s25 = scalar_select %p612_p12, 1, 0 }
  0x12   : > { %s621_s4 = scalar_lea.hbm %s733_s0, %s371_s27  ;;  %s141_s5 = scalar_lea.vmem [#allocation2], %s360_s28 }
  0x13   : > { %s149_s6 = sshll.u32 %s141_s5, 4  ;;  %p625_p13 = pnand %p393_p10, %p597_p5  ;;  %s629_s6 = int_to_ptr.vmem [resolvable:$true] %s149_s6 }
  0x14   : > { %s138_s8 = scalar_lea.sflag [#allocation3], %s137_s26  ;;  %s436_s9 = scalar_lea.hbm %s621_s4, 128 }
  0x15   : > { %p437_p2 = scmp.ne.s32.totalorder %s621_s4, %s436_s9  ;;  %p438_p3 = pneg %p625_p13 }
  0x16   : > { %s441_s17 = scalar_lea.hbm %s733_s0, 256  ;;  %p442_p5 = scmp.lt.u32.totalorder %s621_s4, %s733_s0 }
  0x17   : > { %p439_p4 = pnand %p438_p3, %p437_p2  ;;  %p443_p8 = scmp.lt.u32.totalorder %s441_s17, %s436_s9 }
  0x18   : > { %p445_p9 = scmp.lt.u32.totalorder %s436_s9, %s621_s4 }
  0x19   : > { %p440_p7 = pneg %p439_p4  ;;  %p444_p10 = por %p443_p8, %p442_p5 }
  0x1b   : > { %p446_p0 = por %p445_p9, %p444_p10 }
  0x1d   : > { %p447_p1 = pnand %p446_p0, %p440_p7 }
  0x1f   : > { %450 = shalt.err (!%p447_p1)
}
  0x20   : > { %s451_s22 = scalar_lea.vmem %s629_s6, 128  ;;  %s534_s26 = smov [#allocation2]  }
  0x21   : > { %p452_p2 = scmp.ne.s32.totalorder %s629_s6, %s451_s22  ;;  %s456_s27 = sshll.u32 %s534_s26, 4  ;;  %s457_s27 = int_to_ptr.vmem [resolvable:$false] %s456_s27 }
  0x22   : > { %s458_s28 = scalar_lea.vmem %s457_s27, 256  ;;  %p459_p11 = scmp.lt.s32.totalorder %s629_s6, %s457_s27 }
  0x23   : > { %p454_p4 = pnand %p452_p2, %p438_p3  ;;  %p460_p5 = scmp.lt.s32.totalorder %s458_s28, %s451_s22 }
  0x25   : > { %p455_p12 = pneg %p454_p4  ;;  %p461_p8 = por %p460_p5, %p459_p11 }
  0x27   : > { %p462_p9 = pnand %p461_p8, %p455_p12 }
  0x29   : > { %465 = shalt.err (!%p462_p9)
}
  0x2a   : > { %388 = dma.hbm_to_vmem [thread:$0]  (!%p625_p13), %s621_s4, 128, %s629_s6, %s138_s8  }
  0x2b   : > { %p743_p0 = scmp.lt.s32.totalorder %s532_s15, 3  ;;  %p744_p1 = scmp.ge.s32.totalorder %s532_s15, 1 }
  0x2d   : > { %p155_p3 = pnand %p744_p1, %p743_p0 }
  0x2e   : > { %s663_s29 = sand.u32 (!%p155_p3), 1, %s524_s13  }
  0x2f   : > { %158 = sbr.rel (%p155_p3) target bundleno = 766 (0x2fe), region = 32  ;;  %s364_s30 = sshll.u32 (!%p155_p3), %s663_s29, 3 }
  0x30   : > { %s161_s5 = scalar_lea.sflag (!%p155_p3), [#allocation3], %s663_s29  ;;  %s164_s7 = scalar_lea.vmem (!%p155_p3), [#allocation2], %s364_s30 }
  0x36   : > { %511 = dma.done.wait (%p601_p6), %s161_s5, 128  }
  0x37   : > { %513 = vsyncadd (%p601_p6), %s161_s5, 4294967168  ;;  %vm191_vm0 = vcmask 1043456   ;;  %v187_v0 = vld [vmem:[%s164_s7] sm:$0xff]  ;;  %v535_v27 = vmov 0   ;;  %v536_v39 = vmov 839922192   ;;  %v251_v41 = vlaneseq }
  0x38   : > { %v189_v1 = vcombine.high %v187_v0, %v187_v0  ;;  %v192_v2 = vsel %vm191_vm0, %v187_v0, 0.0  ;;  %429 = vset.pattern.permute.xlu1 %v535_v27  ;;  %430 = vset.pattern.permute.xlu0 %v535_v27  ;;  %v241_v35 = vld [vmem:[%s734_s1] sm:$0xf]  ;;  %v249_v40 = vunpack.c.l.s4 %v536_v39  ;;  %s372_s26 = sshll.u32 %s579_s16, 7  ;;  %s186_s27 = scalar_lea.vmem [#allocation5], %s364_s30 }
  0x39   : > { %v257_v38 = vld [vmem:[%s735_s2] sm:$0xf]  ;;  %v252_v43 = vshrl.u32 %v251_v41, 7  ;;  %s287_s28 = sshll.u32 %s186_s27, 4  ;;  %p745_p11 = scmp.ne.s32.totalorder %s740_s24, 0  ;;  %s691_s28 = int_to_ptr.vmem [resolvable:$true] %s287_s28 }
  0x3a   : > { %v193_v3 = vsel %vm191_vm0, %v189_v1, 0.0  ;;  %v250_v42 = vunpack.c.0.s8 %v249_v40  ;;  %s537_s16 = smov [#allocation5]  }
  0x3b   : > { %v194_v4 = vadd.f32 %v193_v3, %v192_v2  ;;  %s470_s30 = sshll.u32 %s537_s16, 4  ;;  %s471_s30 = int_to_ptr.vmem [resolvable:$false] %s470_s30 }
  0x3c   : > { %v253_v44 = vsub.s32 %v250_v42, %v252_v43  ;;  %p473_p7 = scmp.lt.s32.totalorder %s691_s28, %s471_s30 }
  0x3d   : > { %195 = vadd.xlane.f32.xlu0 %v194_v4 }
  0xca   : > { %v196_v5 = vpop.xlane.xlu0 %195 }
  0xcb   : > { %v197_v6 = vrot.slane %v196_v5, 4 }
  0xcd   : > { %v198_v7 = vadd.f32 %v197_v6, %v196_v5 }
  0xcf   : > { %v199_v8 = vrot.slane %v198_v7, 2 }
  0xd1   : > { %v200_v9 = vadd.f32 %v199_v8, %v198_v7 }
  0xd3   : > { %v201_v10 = vrot.slane %v200_v9, 1 }
  0xd5   : > { %v202_v11 = vadd.f32 %v201_v10, %v200_v9 }
  0xd7   : > { %373 = vpush %v202_v11 }
 0x108   : > { %s374_s4 = spop %373 }
 0x109   : > { %s206_s23 = smul.f32 0.0009765625, %s374_s4  ;;  %s689_s4 = scalar_lea.hbm %s736_s3, %s372_s26 }
 0x10b   : > { %v207_v12 = vstv %s206_s23  ;;  %s273_s23 = scalar_lea.sflag [#allocation4], %s663_s29 }
 0x10c   : > { %v208_v13 = vsub.f32 %v187_v0, %v207_v12 }
 0x10e   : > { %v209_v14 = vmul.f32 %v208_v13, %v208_v13 }
 0x110   : > { %v211_v15 = vcombine.high %v209_v14, %v209_v14  ;;  %v213_v16 = vsel %vm191_vm0, %v209_v14, 0.0 }
 0x112   : > { %v214_v17 = vsel %vm191_vm0, %v211_v15, 0.0 }
 0x113   : > { %v215_v18 = vadd.f32 %v214_v17, %v213_v16 }
 0x115   : > { %216 = vadd.xlane.f32.xlu0 %v215_v18 }
 0x1a2   : > { %v217_v19 = vpop.xlane.xlu0 %216 }
 0x1a3   : > { %v218_v20 = vrot.slane %v217_v19, 4 }
 0x1a5   : > { %v219_v21 = vadd.f32 %v218_v20, %v217_v19 }
 0x1a7   : > { %v220_v22 = vrot.slane %v219_v21, 2 }
 0x1a9   : > { %v221_v23 = vadd.f32 %v220_v22, %v219_v21 }
 0x1ab   : > { %v222_v24 = vrot.slane %v221_v23, 1 }
 0x1ad   : > { %v223_v25 = vadd.f32 %v222_v24, %v221_v23 }
 0x1af   : > { %375 = vpush %v223_v25 }
 0x1e0   : > { %s376_s6 = spop %375 }
 0x1e1   : > { %s227_s8 = smul.f32 0.0009775171, %s376_s6  ;;  %s466_s6 = scalar_lea.vmem %s691_s28, 128 }
 0x1e2   : > { %p467_p6 = scmp.ne.s32.totalorder %s691_s28, %s466_s6 }
 0x1e3   : > { %v228_v26 = vstv %s227_s8  ;;  %s472_s8 = scalar_lea.vmem %s471_s30, 256 }
 0x1e4   : > { %432 = vrsqrt.f32 %v228_v26  ;;  %vm231_vm1 = vcmp.eq.f32.partialorder %v228_v26, inf  ;;  %v234_v30 = vand.u32 2147483648, %v228_v26  ;;  %vm233_vm2 = vcmp.eq.f32.partialorder %v228_v26, 0.0  ;;  %p468_p12 = pnand %p467_p6, %p745_p11  ;;  %p474_p10 = scmp.lt.s32.totalorder %s472_s8, %s466_s6 }
 0x1e6   : > { %p469_p13 = pneg %p468_p12  ;;  %p475_p2 = por %p474_p10, %p473_p7 }
 0x1e8   : > { %p476_p4 = pnand %p475_p2, %p469_p13 }
 0x1ee   : > { %v433_v28 = vpop.eup %432 }
 0x1ef   : > { %v230_v29 = vmul.f32 %v433_v28, %v228_v26 }
 0x1f1   : > { %v232_v31 = vsel %vm231_vm1, %v228_v26, %v230_v29 }
 0x1f2   : > { %v235_v32 = vsel %vm233_vm2, %v234_v30, %v232_v31 }
 0x1f3   : > { %377 = vpush %v235_v32 }
 0x224   : > { %s378_s9 = spop %377 }
 0x225   : > { %s237_s10 = sadd.f32 1e-05, %s378_s9 }
 0x227   : > { %v238_v33 = vstv %s237_s10 }
 0x228   : > { %434 = vrcp.f32 %v238_v33 }
 0x232   : > { %v435_v34 = vpop.eup %434 }
 0x233   : > { %379 = vpush %v435_v34 }
 0x264   : > { %s380_s19 = spop %379 }
 0x265   : > { %v242_v36 = vstv %s380_s19 }
 0x266   : > { %v243_v37 = vmul.f32 %v242_v36, %v241_v35 }
 0x268   : > { %246 = vperm.xlu1 %429, %v243_v37  }
 0x26c   : > { %260 = vperm.xlu1 %429, %v257_v38  }
 0x2e7   : > { %v247_v45 = vpop.permute.xlu1 %246 }
 0x2e8   : > { %v254_v46 = vrot.slane %v247_v45, %v253_v44 }
 0x2ea   : > { %v256_v48 = vmul.f32 %v254_v46, %v208_v13 }
 0x2eb   : > { %v261_v47 = vpop.permute.xlu1 %260 }
 0x2ec   : > { %v268_v49 = vrot.slane %v261_v47, %v253_v44 }
 0x2ee   : > { %v270_v50 = vadd.f32 %v268_v49, %v256_v48 }
 0x2f0   : > { %271 = vst [vmem:[%s186_s27] sm:$0xff] %v270_v50 }
 0x2f1   : > { %479 = shalt.err (!%p476_p4)
}
 0x2f2   : > { %s480_s29 = scalar_lea.hbm %s689_s4, 128  ;;  %s484_s11 = scalar_lea.hbm %s736_s3, 256 }
 0x2f3   : > { %p481_p5 = scmp.ne.s32.totalorder %s689_s4, %s480_s29  ;;  %p485_p0 = scmp.lt.u32.totalorder %s689_s4, %s736_s3 }
 0x2f4   : > { %p486_p1 = scmp.lt.u32.totalorder %s484_s11, %s480_s29  ;;  %p488_p6 = scmp.lt.u32.totalorder %s480_s29, %s689_s4 }
 0x2f5   : > { %p482_p8 = pnand %p481_p5, %p745_p11 }
 0x2f6   : > { %p487_p3 = por %p486_p1, %p485_p0 }
 0x2f7   : > { %p483_p9 = pneg %p482_p8 }
 0x2f8   : > { %p489_p12 = por %p488_p6, %p487_p3 }
 0x2fa   : > { %p490_p13 = pnand %p489_p12, %p483_p9 }
 0x2fc   : > { %493 = shalt.err (!%p490_p13)
}
 0x2fd   : > { %383 = dma.vmem_to_hbm [thread:$0]  (%p745_p11), %s691_s28, 128, %s689_s4, %s273_s23  }
 0x2fe PF: > { %s299_s20 = sand.u32 1, %s520_s12   ;;  %p746_p7 = scmp.ne.s32.totalorder %s741_s25, 0 }
 0x2ff   : > { %p747_p10 = scmp.ge.s32.totalorder %s532_s15, 2  ;;  %s300_s22 = scalar_lea.sflag [#allocation4], %s299_s20 }
 0x301   : > { %p390_p2 = pnand %p747_p10, %p746_p7 }
 0x303   : > { %515 = dma.done.wait (!%p390_p2), %s300_s22, 128  }
 0x304   : > { %517 = vsyncadd (!%p390_p2), %s300_s22, 4294967168  ;;  %p16_p4 = scmp.ge.s32.totalorder %s583_s18, 4   ;;  %s748_s12 = smov %s524_s13 }
 0x305   : > { %s749_s13 = smov %s528_s14  ;;  %s750_s14 = smov %s595_s21 }
 0x306   : > { %s751_s15 = smov %s583_s18  ;;  %18 = sbr.rel (!%p16_p4) target bundleno = 5 (0x5), region = 77 }
 0x30d   :  { %305 = vsyncpa [#allocation3], 1 }
 0x30e   :  { %307 = vsyncpa [#allocation3 + $0x1], 1 }
 0x30f   :  { %308 = vsyncpa [#allocation4], 1 }
 0x310   :  { %310 = vsyncpa [#allocation4 + $0x1], 1 }

</bundles_post_ra>
